<compile_context>
chip_gen: v6e
topology: v6e:2x2x1
jax: 0.10.0
libtpu: 0.0.40
codegen_flags: <defaults>
</compile_context>

<pallas_src>
import math
import functools

import jax
import jax.numpy as jnp
from jax import lax
from jax.experimental import pallas as pl
from jax.experimental.pallas import tpu as pltpu


# ----------------------------------------------------------------------------
# Parameter setup (plain JAX): sinusoidal table, shape (max_len, 1, d_model)
# ----------------------------------------------------------------------------
def make_positional_encoding(d_model: int, max_len: int = 512) -> jnp.ndarray:
    position = jnp.arange(0, max_len, dtype=jnp.float32)[:, None]          # (L, 1)
    div_term = jnp.exp(
        jnp.arange(0, d_model, 2, dtype=jnp.float32) * (-math.log(10000.0) / d_model)
    )                                                                       # (D/2,)
    pe = jnp.zeros((max_len, d_model), dtype=jnp.float32)
    pe = pe.at[:, 0::2].set(jnp.sin(position * div_term))
    pe = pe.at[:, 1::2].set(jnp.cos(position * div_term))
    return pe[:, None, :]                                                   # (L, 1, D)


# ----------------------------------------------------------------------------
# Pallas kernels
# ----------------------------------------------------------------------------
def _pe_add_eval_kernel(seed_ref, x_ref, pe_ref, o_ref):
    # eval mode: dropout is identity.  x block: (tile_s, B, D); pe block: (tile_s, D)
    del seed_ref
    y = x_ref[...].astype(jnp.float32) + pe_ref[...][:, None, :]
    o_ref[...] = y.astype(o_ref.dtype)


def _pe_add_train_kernel(seed_ref, x_ref, pe_ref, o_ref, *, p):
    # training mode: inverted dropout with keep prob (1-p).
    # Counter-based hash PRNG in plain jnp (works on TPU and in interpret mode;
    # pltpu.prng_* has no CPU/interpret lowering).
    tile_s, B, D = x_ref.shape
    y = x_ref[...].astype(jnp.float32) + pe_ref[...][:, None, :]

    shp = (tile_s, B, D)
    rows = lax.broadcasted_iota(jnp.int32, shp, 0)
    bidx = lax.broadcasted_iota(jnp.int32, shp, 1)
    cols = lax.broadcasted_iota(jnp.int32, shp, 2)
    s_glob = rows + pl.program_id(0) * tile_s                 # global seq position
    lin = (s_glob * B + bidx) * D + cols                      # unique per-element counter

    seed_u = seed_ref[0].astype(jnp.uint32)
    h = lin.astype(jnp.uint32) ^ (seed_u * jnp.uint32(0x9E3779B9))
    h = h ^ (h >> 16)
    h = h * jnp.uint32(0x7FEB352D)
    h = h ^ (h >> 15)
    h = h * jnp.uint32(0x846CA68B)
    h = h ^ (h >> 16)

    # integer-domain compare: P(keep) = 1 - p (to within 2^-32)
    thresh = jnp.uint32(min(int(round(p * 2.0 ** 32)), 2 ** 32 - 1))
    keep = h >= thresh
    scale = jnp.float32(1.0 / (1.0 - p))
    o_ref[...] = jnp.where(keep, y * scale, jnp.zeros_like(y)).astype(o_ref.dtype)


# ----------------------------------------------------------------------------
# Wrapper
# ----------------------------------------------------------------------------
def positional_encoding_forward(
    x,
    pe,
    *,
    p: float = 0.1,
    training: bool = False,
    seed: int = 0,
    tile_seq: int | None = None,
    target_block_bytes: int = 4 * 1024 * 1024,   # ~4 MiB per x block: amortizes per-step
                                                 # overhead, double-buffers well under
                                                 # v7x's 64 MiB physical VMEM.
    vmem_limit_bytes: int = 40 * 1024 * 1024,    # above default scoped limit on v5e/v6e/v7x,
                                                 # below v7x's 64 MiB physical ceiling.
):
    """x: (S, B, D); pe: (max_len, 1, D) or (max_len, D) float32."""
    S, B, D = x.shape
    assert 0.0 <= p < 1.0, "dropout p must be in [0, 1)"
    assert pe.shape[0] >= S and pe.shape[-1] == D
    pe2d = pe.reshape(pe.shape[0], D)[:S].astype(jnp.float32)   # (S, D) dense block

    itemsize = jnp.dtype(x.dtype).itemsize
    if tile_seq is None:
        row_bytes = B * D * itemsize
        t = max(1, target_block_bytes // row_bytes)
        if t >= 8:
            t = (t // 8) * 8            # keep seq tiles sublane-friendly
        tile_seq = int(min(S, t))

    grid = (pl.cdiv(S, tile_seq),)

    if training:
        kernel = functools.partial(_pe_add_train_kernel, p=p)
    else:
        kernel = _pe_add_eval_kernel

    seed_arr = jnp.array([seed], dtype=jnp.int32)

    return pl.pallas_call(
        kernel,
        out_shape=jax.ShapeDtypeStruct((S, B, D), x.dtype),
        grid_spec=pltpu.PrefetchScalarGridSpec(
            num_scalar_prefetch=1,
            grid=grid,
            in_specs=[
                pl.BlockSpec((tile_seq, B, D), lambda i, seed: (i, 0, 0)),   # x
                pl.BlockSpec((tile_seq, D), lambda i, seed: (i, 0)),         # pe (2-D, dense)
            ],
            out_specs=pl.BlockSpec((tile_seq, B, D), lambda i, seed: (i, 0, 0)),
        ),
        compiler_params=pltpu.CompilerParams(
            dimension_semantics=("parallel",),     # independent seq tiles -> megacore-shardable
            vmem_limit_bytes=vmem_limit_bytes,
        ),
    )(seed_arr, x, pe2d)


# ----------------------------------------------------------------------------
# Demo / smoke test
# ----------------------------------------------------------------------------
if __name__ == "__main__":
    key = jax.random.PRNGKey(0)
    seq_len, batch, d_model = 8, 2, 32

    x = jax.random.normal(key, (seq_len, batch, d_model), dtype=jnp.float32)
    pe = make_positional_encoding(d_model, max_len=512)

    # --- eval mode (dropout == identity): exact check vs JAX reference -------
    out = jax.block_until_ready(positional_encoding_forward(x, pe, training=False))
    ref = x + pe[:seq_len]
    assert out.shape == (seq_len, batch, d_model) and out.dtype == x.dtype
    assert jnp.allclose(out, ref, atol=1e-6), "eval-mode mismatch vs reference"

    # --- bf16 I/O (math stays f32 in-kernel) ---------------------------------
    x_bf = x.astype(jnp.bfloat16)
    out_bf = jax.block_until_ready(positional_encoding_forward(x_bf, pe, training=False))
    assert out_bf.dtype == jnp.bfloat16
    assert jnp.allclose(out_bf.astype(jnp.float32), ref, atol=5e-2, rtol=5e-2)

    # --- training mode (inverted dropout, p=0.1) ------------------------------
    p = 0.1
    out_tr = jax.block_until_ready(
        positional_encoding_forward(x, pe, p=p, training=True, seed=123)
    )
    assert out_tr.shape == (seq_len, batch, d_model)
    scaled_ref = ref / (1.0 - p)
    ok = jnp.logical_or(out_tr == 0.0,
                        jnp.isclose(out_tr, scaled_ref, atol=1e-5, rtol=1e-5))
    assert bool(jnp.all(ok)), "training-mode values are neither 0 nor scaled (x+pe)"

    print("KERNEL_OK")
</pallas_src>

<mosaic_0001>
module attributes {stable_mosaic.version = 11 : i64} {
  func.func @_pe_add_eval_kernel(%arg0: i32, %arg1: memref<1xi32, #tpu.memory_space<smem>>, %arg2: memref<8x2x32xf32, #tpu.memory_space<vmem>>, %arg3: memref<8x32xf32, #tpu.memory_space<vmem>>, %arg4: memref<8x2x32xf32, #tpu.memory_space<vmem>>) attributes {dimension_semantics = [#tpu.dimension_semantics<parallel>], iteration_bounds = array<i64: 1>, scalar_prefetch = 1 : i64, scratch_operands = 0 : i64, tpu.core_type = #tpu.core_type<tc>, window_params = [{transform_indices = @transform_0, window_bounds = array<i64: 8, 2, 32>}, {transform_indices = @transform_1, window_bounds = array<i64: 8, 32>}, {transform_indices = @transform_2, window_bounds = array<i64: 8, 2, 32>}]} {
    %c0 = arith.constant 0 : index
    %c0_0 = arith.constant 0 : index
    %c0_1 = arith.constant 0 : index
    %0 = vector.load %arg2[%c0, %c0_0, %c0_1] : memref<8x2x32xf32, #tpu.memory_space<vmem>>, vector<8x2x32xf32>
    %c0_2 = arith.constant 0 : index
    %c0_3 = arith.constant 0 : index
    %1 = vector.load %arg3[%c0_2, %c0_3] : memref<8x32xf32, #tpu.memory_space<vmem>>, vector<8x32xf32>
    %2 = vector.shape_cast %1 : vector<8x32xf32> to vector<8x1x32xf32>
    %3 = vector.broadcast %2 : vector<8x1x32xf32> to vector<8x2x32xf32>
    %4 = arith.addf %0, %3 : vector<8x2x32xf32>
    %c0_4 = arith.constant 0 : index
    %c0_5 = arith.constant 0 : index
    %c0_6 = arith.constant 0 : index
    %5 = vector.load %arg4[%c0_4, %c0_5, %c0_6] : memref<8x2x32xf32, #tpu.memory_space<vmem>>, vector<8x2x32xf32>
    tpu.vector_store %arg4[%c0_4, %c0_5, %c0_6], %4 {strides = array<i32>} : memref<8x2x32xf32, #tpu.memory_space<vmem>>, vector<8x2x32xf32>,
    return
  }
  func.func @transform_0(%arg0: i32, %arg1: memref<1xi32, #tpu.memory_space<smem>>) -> (i32, i32, i32) {
    %c0_i32 = arith.constant 0 : i32
    %c0_i32_0 = arith.constant 0 : i32
    %c0_i32_1 = arith.constant 0 : i32
    return %arg0, %c0_i32, %c0_i32_0 : i32, i32, i32
  }
  func.func @transform_1(%arg0: i32, %arg1: memref<1xi32, #tpu.memory_space<smem>>) -> (i32, i32) {
    %c0_i32 = arith.constant 0 : i32
    %c0_i32_0 = arith.constant 0 : i32
    return %arg0, %c0_i32 : i32, i32
  }
  func.func @transform_2(%arg0: i32, %arg1: memref<1xi32, #tpu.memory_space<smem>>) -> (i32, i32, i32) {
    %c0_i32 = arith.constant 0 : i32
    %c0_i32_0 = arith.constant 0 : i32
    %c0_i32_1 = arith.constant 0 : i32
    return %arg0, %c0_i32, %c0_i32_0 : i32, i32, i32
  }
}

</mosaic_0001>

<bundles_post_ra>
// kernel: tpu_custom_call.1
= control target key start
LH: loop header
LB: loop body
LE: loop exit
PB: predicated region body
PF: predicated region fallthrough
CT: control target
= control target key end

     0   :  { %9 = vsyncpa [#allocation5], 0  ;;  %s295_s0 = inlined_call_operand.<no memory space> [shape: s32[1], index: 0, kind: input, shape index: {}]   ;;  %s296_s1 = inlined_call_operand.hbm [shape: f32[8,2,32], index: 1, kind: input, shape index: {}]   ;;  %s297_s2 = inlined_call_operand.hbm [shape: f32[8,32], index: 2, kind: input, shape index: {}]   ;;  %s298_s3 = inlined_call_operand.hbm [shape: f32[8,2,32], index: 3, kind: output, shape index: {}]  }
   0x1   :  { %10 = vsyncpa [#allocation8], 0 }
   0x2   :  { %11 = vsyncpa [#allocation6], 0  ;;  %s246_s12 = smov [#allocation4]  }
   0x3   :  { %s17_s13 = sshll.u32 %s246_s12, 4  ;;  %s18_s13 = int_to_ptr.vmem [resolvable:$true] %s17_s13 }
   0x4   :  { %s188_s14 = scalar_lea.vmem %s18_s13, 256  ;;  %p193_p1 = scmp.lt.s32.totalorder %s18_s13, %s18_s13 }
   0x5   :  { %p189_p0 = scmp.ne.s32.totalorder %s18_s13, %s188_s14  ;;  %p194_p2 = scmp.lt.s32.totalorder %s188_s14, %s188_s14 }
   0x7   :  { %p195_p3 = por %p194_p2, %p193_p1 }
   0x9   :  { %p196_p4 = pnand %p195_p3, %p189_p0 }
   0xb   :  { %199 = shalt.err (!%p196_p4)
}
   0xc   :  { %s247_s0 = smov 32   ;;  %s248_s15 = smov 2  }
   0xd   :  { %23 = dma.hbm_to_vmem [thread:$0]  %s296_s1, 256, %s18_s13, [#allocation5], %s247_s0, %s247_s0, %s248_s15  }
   0xe   :  { %s249_s18 = smov [#allocation7]  }
   0xf   :  { %s30_s19 = sshll.u32 %s249_s18, 4  ;;  %s31_s19 = int_to_ptr.vmem [resolvable:$true] %s30_s19 }
  0x10   :  { %s208_s20 = scalar_lea.vmem %s31_s19, 128  ;;  %p213_p6 = scmp.lt.s32.totalorder %s31_s19, %s31_s19 }
  0x11   :  { %p209_p5 = scmp.ne.s32.totalorder %s31_s19, %s208_s20  ;;  %p214_p7 = scmp.lt.s32.totalorder %s208_s20, %s208_s20 }
  0x13   :  { %p215_p8 = por %p214_p7, %p213_p6 }
  0x15   :  { %p216_p9 = pnand %p215_p8, %p209_p5 }
  0x17   :  { %219 = shalt.err (!%p216_p9)
}
  0x18   :  { %33 = dma.hbm_to_vmem [thread:$0]  %s297_s2, 128, %s31_s19, [#allocation8]  }
  0x19   :  { %240 = dma.done.wait [#allocation5], 256  }
  0x1a   :  { %241 = vsyncadd [#allocation5], 4294967040 }
  0x1b   :  { %242 = dma.done.wait [#allocation8], 128  }
  0x1c   :  { %243 = vsyncadd [#allocation8], 4294967168  ;;  %v54_v0 = vlaneseq  ;;  %v250_v1 = vmov 1966171168   ;;  %v48_v6 = vld [vmem:[#allocation7] sm:$0xff]  ;;  %vm147_vm0 = vcmask 254976  }
  0x1d   :  { %v52_v2 = vunpack.c.l.s4 %v250_v1  ;;  %v50_v9 = vcombine.high %v48_v6, %v48_v6  ;;  %v40_v13 = vld [vmem:[#allocation4] sm:$0x3]  ;;  %v41_v18 = vld [vmem:[#allocation4 + $0x2] sm:$0x3]  ;;  %v42_v19 = vld [vmem:[#allocation4 + $0x4] sm:$0x3] }
  0x1e   :  { %v55_v3 = vshrl.u32 %v54_v0, 7  ;;  %v44_v25 = vld [vmem:[#allocation4 + $0x8] sm:$0x3]  ;;  %v43_v26 = vld [vmem:[#allocation4 + $0x6] sm:$0x3]  ;;  %s251_s1 = smov [#allocation9]  }
  0x1f   :  { %v53_v4 = vunpack.c.0.s8 %v52_v2  ;;  %v45_v33 = vld [vmem:[#allocation4 + $0xa] sm:$0x3]  ;;  %v46_v34 = vld [vmem:[#allocation4 + $0xc] sm:$0x3]  ;;  %v47_v40 = vld [vmem:[#allocation4 + $0xe] sm:$0x3] }
  0x20   :  { %v101_v8 = vsub.s32 0, %v55_v3  ;;  %s161_s2 = sshll.u32 %s251_s1, 4  ;;  %s162_s2 = int_to_ptr.vmem [resolvable:$true] %s161_s2 }
  0x21   :  { %v56_v5 = vsub.s32 %v53_v4, %v55_v3  ;;  %s220_s23 = scalar_lea.vmem %s162_s2, 256  ;;  %p225_p11 = scmp.lt.s32.totalorder %s162_s2, %s162_s2 }
  0x22   :  { %p221_p10 = scmp.ne.s32.totalorder %s162_s2, %s220_s23  ;;  %p226_p12 = scmp.lt.s32.totalorder %s220_s23, %s220_s23 }
  0x23   :  { %v57_v7 = vrot.slane %v48_v6, %v56_v5  ;;  %v64_v12 = vrot.slane %v50_v9, %v56_v5 }
  0x24   :  { %p227_p13 = por %p226_p12, %p225_p11 }
  0x25   :  { %v73_v10 = vrot.slane %v57_v7, %v56_v5  ;;  %v65_v11 = vcombine.high %v57_v7, %v57_v7  ;;  %v80_v17 = vrot.slane %v64_v12, %v56_v5  ;;  %v66_v20 = vcombine.high %v64_v12, %v64_v12 }
  0x26   :  { %p228_p0 = pnand %p227_p13, %p221_p10 }
  0x27   :  { %v102_v14 = vrot.slane %v73_v10, %v101_v8  ;;  %v87_v15 = vrot.slane %v65_v11, %v56_v5  ;;  %v95_v16 = vcombine.high %v73_v10, %v73_v10  ;;  %v118_v27 = vrot.slane %v80_v17, %v101_v8 }
  0x28   :  { %v94_v28 = vrot.slane %v66_v20, %v56_v5  ;;  %v96_v29 = vcombine.high %v80_v17, %v80_v17 }
  0x29   :  { %v139_v21 = vadd.f32 %v102_v14, %v40_v13  ;;  %v106_v22 = vrot.slane %v87_v15, %v101_v8  ;;  %v110_v23 = vrot.slane %v95_v16, %v101_v8  ;;  %v97_v24 = vcombine.high %v87_v15, %v87_v15 }
  0x2a   :  { %v143_v35 = vadd.f32 %v118_v27, %v44_v25  ;;  %v122_v36 = vrot.slane %v94_v28, %v101_v8  ;;  %v126_v37 = vrot.slane %v96_v29, %v101_v8  ;;  %v98_v38 = vcombine.high %v94_v28, %v94_v28 }
  0x2b   :  { %148 = vst.msk [vmem:[#allocation9] sm:$0x3] %vm147_vm0, %v139_v21  ;;  %v140_v30 = vadd.f32 %v106_v22, %v41_v18  ;;  %v141_v31 = vadd.f32 %v110_v23, %v42_v19  ;;  %v114_v32 = vrot.slane %v97_v24, %v101_v8 }
  0x2c   :  { %152 = vst.msk [vmem:[#allocation9 + $0x8] sm:$0x3] %vm147_vm0, %v143_v35  ;;  %v144_v41 = vadd.f32 %v122_v36, %v45_v33  ;;  %v145_v42 = vadd.f32 %v126_v37, %v46_v34  ;;  %v130_v43 = vrot.slane %v98_v38, %v101_v8 }
  0x2d   :  { %149 = vst.msk [vmem:[#allocation9 + $0x2] sm:$0x3] %vm147_vm0, %v140_v30  ;;  %150 = vst.msk [vmem:[#allocation9 + $0x4] sm:$0x3] %vm147_vm0, %v141_v31  ;;  %v142_v39 = vadd.f32 %v114_v32, %v43_v26 }
  0x2e   :  { %153 = vst.msk [vmem:[#allocation9 + $0xa] sm:$0x3] %vm147_vm0, %v144_v41  ;;  %154 = vst.msk [vmem:[#allocation9 + $0xc] sm:$0x3] %vm147_vm0, %v145_v42  ;;  %v146_v44 = vadd.f32 %v130_v43, %v47_v40 }
  0x2f   :  { %151 = vst.msk [vmem:[#allocation9 + $0x6] sm:$0x3] %vm147_vm0, %v142_v39 }
  0x30   :  { %155 = vst.msk [vmem:[#allocation9 + $0xe] sm:$0x3] %vm147_vm0, %v146_v44 }
  0x31   :  { %231 = shalt.err (!%p228_p0)
}
  0x32   :  { %167 = dma.vmem_to_hbm [thread:$0]  %s162_s2, 256, %s298_s3, [#allocation6], %s247_s0, %s247_s0, %s248_s15  }
  0x33   :  { %244 = dma.done.wait [#allocation6], 256  }
  0x34   :  { %245 = vsyncadd [#allocation6], 4294967040 }
  0x35   :  { %171 = vsyncpa [#allocation5], 1 }
  0x36   :  { %172 = vsyncpa [#allocation8], 1 }
  0x37   :  { %173 = vsyncpa [#allocation6], 1 }

</bundles_post_ra>
